<compile_context>
chip_gen: v5e
topology: v5e:2x2
jax: 0.10.0
libtpu: 0.0.40
codegen_flags: <defaults>
</compile_context>

<pallas_src>
import functools

import jax
import jax.numpy as jnp
from jax import lax
from jax.experimental import pallas as pl
from jax.experimental.pallas import tpu as pltpu  # noqa: F401  (TPU backend)

LANE = 128


def _round_up(x, m):
    return ((x + m - 1) // m) * m


# ----------------------------- Pallas kernel ------------------------------- #

def _fused_hyper_kernel(z_ref, w2_ref, b2_ref, w1_ref, b1_ref, o_ref, *,
                        in_size, z_dim, n_pad):
    """Both hypernetwork layers for every latent, fused in one kernel.

    h1 = z @ w2 + b2                      (nz, in_size*z_dim)  -- stays in vregs
    for each in-row i (static unroll):
        out[:, i*n_pad:(i+1)*n_pad] = h1[:, i*z_dim:(i+1)*z_dim] @ w1p + b1p

    The per-i matmul replaces the old block-diagonal kron weight: only the dense
    (z_dim, n_pad) weight is DMA'd.  The z_dim-lane slices of h1 cost a few XLU
    selects, but XLU slots are idle in this kernel.
    """
    h1 = (jnp.dot(z_ref[...], w2_ref[...], preferred_element_type=jnp.float32)
          + b2_ref[...])
    w1 = w1_ref[...]
    b1 = b1_ref[...]
    outs = []
    for i in range(in_size):                        # static trip count -> static slices
        blk = h1[:, i * z_dim:(i + 1) * z_dim]      # (nz, z_dim)
        outs.append(jnp.dot(blk, w1, preferred_element_type=jnp.float32) + b1)
    # One lane-dense store of the whole (nz, in_size*n_pad) tile (each piece is a
    # 128-lane-aligned block, so the concat is a free register arrangement).
    o_ref[...] = jnp.concatenate(outs, axis=1)


def fused_hyper_net(z, w2, b2_row, w1p, b1p_row, *, in_size, z_dim, n_pad):
    """Single pallas_call; every operand is one full-array VMEM block (no grid)."""
    m, zd = z.shape
    kd, n1 = w2.shape
    assert zd == z_dim and kd == z_dim and n1 == in_size * z_dim
    assert w1p.shape == (z_dim, n_pad) and b1p_row.shape == (1, n_pad)
    assert b2_row.shape == (1, n1)
    n2 = in_size * n_pad

    kernel = functools.partial(_fused_hyper_kernel, in_size=in_size,
                               z_dim=z_dim, n_pad=n_pad)
    flops = 2 * m * z_dim * n1 + 2 * in_size * m * z_dim * n_pad
    bytes_accessed = 4 * (m * zd + kd * n1 + n1 + z_dim * n_pad + n_pad + m * n2)

    return pl.pallas_call(
        kernel,
        out_shape=jax.ShapeDtypeStruct((m, n2), jnp.float32),
        in_specs=[
            pl.BlockSpec((m, zd), lambda: (0, 0)),        # latents (block == full array)
            pl.BlockSpec((kd, n1), lambda: (0, 0)),       # layer-2 weight
            pl.BlockSpec((1, n1), lambda: (0, 0)),        # layer-2 bias row
            pl.BlockSpec((z_dim, n_pad), lambda: (0, 0)), # layer-1 weight (dense, padded)
            pl.BlockSpec((1, n_pad), lambda: (0, 0)),     # layer-1 bias row (padded)
        ],
        out_specs=pl.BlockSpec((m, n2), lambda: (0, 0)),
        cost_estimate=pl.CostEstimate(flops=flops, transcendentals=0,
                                      bytes_accessed=bytes_accessed),
    )(z, w2, b2_row, w1p, b1p_row)


# --------------------------- HyperNetwork (params) -------------------------- #

def _fmod2(a):
    return jnp.fmod(a, 2.0)  # matches torch.fmod(torch.randn(...), 2)


def init_hyper_net(key, z_dim, in_size, out_size, f_size):
    k1, k2, k3, k4 = jax.random.split(key, 4)
    w1 = _fmod2(jax.random.normal(k1, (z_dim, out_size * f_size * f_size), jnp.float32))
    b1 = _fmod2(jax.random.normal(k2, (out_size * f_size * f_size,), jnp.float32))
    w2 = _fmod2(jax.random.normal(k3, (z_dim, in_size * z_dim), jnp.float32))
    b2 = _fmod2(jax.random.normal(k4, (in_size * z_dim,), jnp.float32))
    return dict(w1=w1, b1=b1, w2=w2, b2=b2,
                z_dim=z_dim, in_size=in_size, out_size=out_size, f_size=f_size)


def pack_hyper_params(params):
    """One-time layout prep: zero-pad layer-1 weight/bias to a 128-lane multiple.

    No block-diagonal kron expansion any more -- the kernel applies the dense
    (z_dim, n_pad) weight once per in-row.
    """
    z_dim, in_size = params["z_dim"], params["in_size"]
    n_out = params["out_size"] * params["f_size"] * params["f_size"]
    n_pad = _round_up(n_out, LANE)
    w1p = jnp.zeros((z_dim, n_pad), jnp.float32).at[:, :n_out].set(params["w1"])
    b1p = jnp.zeros((1, n_pad), jnp.float32).at[0, :n_out].set(params["b1"])
    return dict(w2=params["w2"],
                b2=params["b2"].reshape(1, in_size * z_dim),
                w1p=w1p, b1p=b1p, n_pad=int(n_pad))


# ------------------------------ Embedding ----------------------------------- #

@functools.partial(jax.jit, static_argnames=("z_num", "in_size", "out_size", "f_size"))
def embedding_forward(z, packed, *, z_num, in_size, out_size, f_size):
    """z: (h*k, z_dim) pre-stacked latents (the ParameterList kept as one array)."""
    h, k = z_num
    nz, z_dim = z.shape
    n_out = out_size * f_size * f_size
    n_pad = _round_up(n_out, LANE)

    out2 = fused_hyper_net(z, packed["w2"], packed["b2"], packed["w1p"],
                           packed["b1p"], in_size=in_size, z_dim=z_dim,
                           n_pad=n_pad)                          # (nz, in*n_pad)

    # out2[n, i*n_pad : i*n_pad + n_out] == h_final[latent n, in-row i, :]
    hf = out2.reshape(nz, in_size, n_pad)[:, :, :n_out]          # (nz, in, out*f*f)
    # PyTorch .view reinterpretation: flat (in * out*f*f) -> (out, in, f, f)
    blocks = hf.reshape(nz, out_size, in_size, f_size, f_size)
    # torch.cat over k (dim=1) then h (dim=0), done as reshape + transpose.
    final = blocks.reshape(h, k, out_size, in_size, f_size, f_size)
    final = final.transpose(0, 2, 1, 3, 4, 5)
    return final.reshape(h * out_size, k * in_size, f_size, f_size)


# ------------------------------ Reference ----------------------------------- #

def _hyper_net_ref(params, z):
    h_in = jnp.dot(z, params["w2"], precision=lax.Precision.HIGHEST) + params["b2"]
    h_in = h_in.reshape(params["in_size"], params["z_dim"])
    h_final = jnp.dot(h_in, params["w1"], precision=lax.Precision.HIGHEST) + params["b1"]
    return h_final.reshape(params["out_size"], params["in_size"],
                           params["f_size"], params["f_size"])


def embedding_forward_ref(z_rows, z_num, params):
    h, k = z_num
    ww = []
    for i in range(h):
        w = [_hyper_net_ref(params, z_rows[i * k + j]) for j in range(k)]
        ww.append(jnp.concatenate(w, axis=1))
    return jnp.concatenate(ww, axis=0)


# --------------------------------- main -------------------------------------- #

if __name__ == "__main__":
    z_num = (2, 2)            # (h, k)
    z_dim = 32
    in_size, out_size, f_size = 8, 8, 3

    key = jax.random.PRNGKey(0)
    key_hn, key_z = jax.random.split(key)
    hyper_params = init_hyper_net(key_hn, z_dim, in_size, out_size, f_size)
    packed = pack_hyper_params(hyper_params)

    h, k = z_num
    nz = h * k
    # ParameterList kept as one pre-stacked (nz, z_dim) array; deterministic stand-in
    # for Parameter(torch.fmod(torch.randn(z_dim), 2)) per latent.
    z = _fmod2(jax.random.normal(key_z, (nz, z_dim), jnp.float32))

    out = embedding_forward(z, packed, z_num=z_num, in_size=in_size,
                            out_size=out_size, f_size=f_size)
    out = jax.block_until_ready(out)

    ref = embedding_forward_ref([z[i] for i in range(nz)], z_num, hyper_params)
    assert out.shape == (h * out_size, k * in_size, f_size, f_size), out.shape
    # All-f32 MXU path vs HIGHEST-precision reference; atol covers accumulation-order
    # differences on values of magnitude O(100).
    assert jnp.allclose(out, ref, rtol=1e-4, atol=1e-3), "mismatch vs reference"

    print("KERNEL_OK")
</pallas_src>

<mosaic_0001>
module attributes {stable_mosaic.version = 11 : i64} {
  func.func @_fused_hyper_kernel(%arg0: memref<4x32xf32, #tpu.memory_space<vmem>>, %arg1: memref<32x256xf32, #tpu.memory_space<vmem>>, %arg2: memref<1x256xf32, #tpu.memory_space<vmem>>, %arg3: memref<32x128xf32, #tpu.memory_space<vmem>>, %arg4: memref<1x128xf32, #tpu.memory_space<vmem>>, %arg5: memref<4x1024xf32, #tpu.memory_space<vmem>>) attributes {dimension_semantics = [], scalar_prefetch = 0 : i64, scratch_operands = 0 : i64, tpu.core_type = #tpu.core_type<tc>} {
    %c0 = arith.constant 0 : index
    %c0_0 = arith.constant 0 : index
    %0 = vector.load %arg0[%c0, %c0_0] : memref<4x32xf32, #tpu.memory_space<vmem>>, vector<4x32xf32>
    %c0_1 = arith.constant 0 : index
    %c0_2 = arith.constant 0 : index
    %1 = vector.load %arg1[%c0_1, %c0_2] : memref<32x256xf32, #tpu.memory_space<vmem>>, vector<32x256xf32>
    %cst = arith.constant dense<0.000000e+00> : vector<4x256xf32>
    %2 = tpu.matmul %0, %1, %cst {dimension_numbers = #tpu.dot_dimension_numbers<[1], [0], [0], [1], [0, 0, 1, 1], [], []>} : vector<4x32xf32>, vector<32x256xf32>, vector<4x256xf32> -> vector<4x256xf32>
    %c0_3 = arith.constant 0 : index
    %c0_4 = arith.constant 0 : index
    %3 = vector.load %arg2[%c0_3, %c0_4] : memref<1x256xf32, #tpu.memory_space<vmem>>, vector<1x256xf32>
    %4 = vector.broadcast %3 : vector<1x256xf32> to vector<4x256xf32>
    %5 = arith.addf %2, %4 : vector<4x256xf32>
    %c0_5 = arith.constant 0 : index
    %c0_6 = arith.constant 0 : index
    %6 = vector.load %arg3[%c0_5, %c0_6] : memref<32x128xf32, #tpu.memory_space<vmem>>, vector<32x128xf32>
    %c0_7 = arith.constant 0 : index
    %c0_8 = arith.constant 0 : index
    %7 = vector.load %arg4[%c0_7, %c0_8] : memref<1x128xf32, #tpu.memory_space<vmem>>, vector<1x128xf32>
    %8 = vector.extract_strided_slice %5 {offsets = [0, 0], sizes = [4, 32], strides = [1, 1]} : vector<4x256xf32> to vector<4x32xf32>
    %cst_9 = arith.constant dense<0.000000e+00> : vector<4x128xf32>
    %9 = tpu.matmul %8, %6, %cst_9 {dimension_numbers = #tpu.dot_dimension_numbers<[1], [0], [0], [1], [0, 0, 1, 1], [], []>} : vector<4x32xf32>, vector<32x128xf32>, vector<4x128xf32> -> vector<4x128xf32>
    %10 = vector.broadcast %7 : vector<1x128xf32> to vector<4x128xf32>
    %11 = arith.addf %9, %10 : vector<4x128xf32>
    %12 = vector.extract_strided_slice %5 {offsets = [0, 32], sizes = [4, 32], strides = [1, 1]} : vector<4x256xf32> to vector<4x32xf32>
    %cst_10 = arith.constant dense<0.000000e+00> : vector<4x128xf32>
    %13 = tpu.matmul %12, %6, %cst_10 {dimension_numbers = #tpu.dot_dimension_numbers<[1], [0], [0], [1], [0, 0, 1, 1], [], []>} : vector<4x32xf32>, vector<32x128xf32>, vector<4x128xf32> -> vector<4x128xf32>
    %14 = vector.broadcast %7 : vector<1x128xf32> to vector<4x128xf32>
    %15 = arith.addf %13, %14 : vector<4x128xf32>
    %16 = vector.extract_strided_slice %5 {offsets = [0, 64], sizes = [4, 32], strides = [1, 1]} : vector<4x256xf32> to vector<4x32xf32>
    %cst_11 = arith.constant dense<0.000000e+00> : vector<4x128xf32>
    %17 = tpu.matmul %16, %6, %cst_11 {dimension_numbers = #tpu.dot_dimension_numbers<[1], [0], [0], [1], [0, 0, 1, 1], [], []>} : vector<4x32xf32>, vector<32x128xf32>, vector<4x128xf32> -> vector<4x128xf32>
    %18 = vector.broadcast %7 : vector<1x128xf32> to vector<4x128xf32>
    %19 = arith.addf %17, %18 : vector<4x128xf32>
    %20 = vector.extract_strided_slice %5 {offsets = [0, 96], sizes = [4, 32], strides = [1, 1]} : vector<4x256xf32> to vector<4x32xf32>
    %cst_12 = arith.constant dense<0.000000e+00> : vector<4x128xf32>
    %21 = tpu.matmul %20, %6, %cst_12 {dimension_numbers = #tpu.dot_dimension_numbers<[1], [0], [0], [1], [0, 0, 1, 1], [], []>} : vector<4x32xf32>, vector<32x128xf32>, vector<4x128xf32> -> vector<4x128xf32>
    %22 = vector.broadcast %7 : vector<1x128xf32> to vector<4x128xf32>
    %23 = arith.addf %21, %22 : vector<4x128xf32>
    %24 = vector.extract_strided_slice %5 {offsets = [0, 128], sizes = [4, 32], strides = [1, 1]} : vector<4x256xf32> to vector<4x32xf32>
    %cst_13 = arith.constant dense<0.000000e+00> : vector<4x128xf32>
    %25 = tpu.matmul %24, %6, %cst_13 {dimension_numbers = #tpu.dot_dimension_numbers<[1], [0], [0], [1], [0, 0, 1, 1], [], []>} : vector<4x32xf32>, vector<32x128xf32>, vector<4x128xf32> -> vector<4x128xf32>
    %26 = vector.broadcast %7 : vector<1x128xf32> to vector<4x128xf32>
    %27 = arith.addf %25, %26 : vector<4x128xf32>
    %28 = vector.extract_strided_slice %5 {offsets = [0, 160], sizes = [4, 32], strides = [1, 1]} : vector<4x256xf32> to vector<4x32xf32>
    %cst_14 = arith.constant dense<0.000000e+00> : vector<4x128xf32>
    %29 = tpu.matmul %28, %6, %cst_14 {dimension_numbers = #tpu.dot_dimension_numbers<[1], [0], [0], [1], [0, 0, 1, 1], [], []>} : vector<4x32xf32>, vector<32x128xf32>, vector<4x128xf32> -> vector<4x128xf32>
    %30 = vector.broadcast %7 : vector<1x128xf32> to vector<4x128xf32>
    %31 = arith.addf %29, %30 : vector<4x128xf32>
    %32 = vector.extract_strided_slice %5 {offsets = [0, 192], sizes = [4, 32], strides = [1, 1]} : vector<4x256xf32> to vector<4x32xf32>
    %cst_15 = arith.constant dense<0.000000e+00> : vector<4x128xf32>
    %33 = tpu.matmul %32, %6, %cst_15 {dimension_numbers = #tpu.dot_dimension_numbers<[1], [0], [0], [1], [0, 0, 1, 1], [], []>} : vector<4x32xf32>, vector<32x128xf32>, vector<4x128xf32> -> vector<4x128xf32>
    %34 = vector.broadcast %7 : vector<1x128xf32> to vector<4x128xf32>
    %35 = arith.addf %33, %34 : vector<4x128xf32>
    %36 = vector.extract_strided_slice %5 {offsets = [0, 224], sizes = [4, 32], strides = [1, 1]} : vector<4x256xf32> to vector<4x32xf32>
    %cst_16 = arith.constant dense<0.000000e+00> : vector<4x128xf32>
    %37 = tpu.matmul %36, %6, %cst_16 {dimension_numbers = #tpu.dot_dimension_numbers<[1], [0], [0], [1], [0, 0, 1, 1], [], []>} : vector<4x32xf32>, vector<32x128xf32>, vector<4x128xf32> -> vector<4x128xf32>
    %38 = vector.broadcast %7 : vector<1x128xf32> to vector<4x128xf32>
    %39 = arith.addf %37, %38 : vector<4x128xf32>
    %40 = tpu.concatenate %11, %15, %19, %23, %27, %31, %35, %39 in 1 : vector<4x128xf32>, vector<4x128xf32>, vector<4x128xf32>, vector<4x128xf32>, vector<4x128xf32>, vector<4x128xf32>, vector<4x128xf32>, vector<4x128xf32> -> vector<4x1024xf32>
    %c0_17 = arith.constant 0 : index
    %c0_18 = arith.constant 0 : index
    %41 = vector.load %arg5[%c0_17, %c0_18] : memref<4x1024xf32, #tpu.memory_space<vmem>>, vector<4x1024xf32>
    tpu.vector_store %arg5[%c0_17, %c0_18], %40 {strides = array<i32>} : memref<4x1024xf32, #tpu.memory_space<vmem>>, vector<4x1024xf32>,
    return
  }
}

</mosaic_0001>

<bundles_post_ra>
// kernel: embedding_forward.1
= control target key start
LH: loop header
LB: loop body
LE: loop exit
PB: predicated region body
PF: predicated region fallthrough
CT: control target
= control target key end

     0   :  { %10 = vsyncpa [#allocation3], 0  ;;  %s613_s0 = inlined_call_operand.hbm [shape: f32[4,32], index: 0, kind: input, shape index: {}]   ;;  %s614_s1 = inlined_call_operand.hbm [shape: f32[32,256], index: 1, kind: input, shape index: {}]   ;;  %s615_s2 = inlined_call_operand.hbm [shape: f32[1,256], index: 2, kind: input, shape index: {}]   ;;  %s616_s3 = inlined_call_operand.hbm [shape: f32[32,128], index: 3, kind: input, shape index: {}]   ;;  %s617_s4 = inlined_call_operand.hbm [shape: f32[1,128], index: 4, kind: input, shape index: {}]   ;;  %s618_s5 = inlined_call_operand.vmem [shape: f32[4,1024], index: 5, kind: output, shape index: {}]  }
   0x1   :  { %11 = vsyncpa [#allocation5], 0  ;;  %s28_s20 = sshll.u32 %s614_s1, 4  ;;  %s29_s20 = int_to_ptr.hbm [resolvable:$true] %s28_s20 }
   0x2   :  { %12 = vsyncpa [#allocation8], 0  ;;  %s530_s21 = smov [#allocation4]   ;;  %s52_s25 = sshll.u32 %s616_s3, 4  ;;  %s53_s25 = int_to_ptr.hbm [resolvable:$true] %s52_s25 }
   0x3   :  { %s30_s22 = sshll.u32 %s530_s21, 4  ;;  %s531_s26 = smov 256   ;;  %s31_s22 = int_to_ptr.vmem [resolvable:$true] %s30_s22 }
   0x4   :  { %s532_s27 = smov 16   ;;  %s533_s28 = smov [#allocation7]  }
   0x5   :  { %36 = dma.hbm_to_vmem [thread:$0]  %s29_s20, 1024, %s31_s22, [#allocation5], %s531_s26, %s531_s26, %s532_s27  }
   0x6   :  { %s54_s29 = sshll.u32 %s533_s28, 4  ;;  %s534_s30 = smov 128   ;;  %s55_s29 = int_to_ptr.vmem [resolvable:$true] %s54_s29 }
   0x7   :  { %s535_s6 = smov 8   ;;  %s18_s8 = sshll.u32 %s613_s0, 4  ;;  %s19_s8 = int_to_ptr.hbm [resolvable:$true] %s18_s8 }
   0x8   :  { %60 = dma.hbm_to_vmem [thread:$0]  %s53_s25, 512, %s55_s29, [#allocation8], %s534_s30, %s534_s30, %s535_s6  }
   0x9   :  { %s536_s9 = smov [#allocation2]   ;;  %s42_s12 = sshll.u32 %s615_s2, 4  ;;  %s43_s12 = int_to_ptr.hbm [resolvable:$true] %s42_s12 }
   0xa   :  { %s20_s10 = sshll.u32 %s536_s9, 4  ;;  %s537_s13 = smov [#allocation6]   ;;  %s21_s10 = int_to_ptr.vmem [resolvable:$true] %s20_s10 }
   0xb   :  { %23 = dma.hbm_to_vmem [thread:$0]  %s19_s8, 64, %s21_s10, [#allocation3]  }
   0xc   :  { %s44_s14 = sshll.u32 %s537_s13, 4  ;;  %s66_s17 = sshll.u32 %s617_s4, 4  ;;  %s45_s14 = int_to_ptr.vmem [resolvable:$true] %s44_s14  ;;  %s67_s17 = int_to_ptr.hbm [resolvable:$true] %s66_s17 }
   0xd   :  { %47 = dma.hbm_to_vmem [thread:$0]  %s43_s12, 32, %s45_s14, [#allocation5]  }
   0xe   :  { %s538_s0 = smov [#allocation9]  }
   0xf   :  { %s68_s18 = sshll.u32 %s538_s0, 4  ;;  %s69_s18 = int_to_ptr.vmem [resolvable:$true] %s68_s18 }
  0x10   :  { %71 = dma.hbm_to_vmem [thread:$0]  %s67_s17, 16, %s69_s18, [#allocation8]  }
  0x11   :  { %524 = dma.done.wait [#allocation3], 64  }
  0x12   :  { %525 = vsyncadd [#allocation3], 4294967232 }
  0x13   :  { %526 = dma.done.wait [#allocation5], 1056  }
  0x14   :  { %527 = vsyncadd [#allocation5], 4294966240 }
  0x15   :  { %528 = dma.done.wait [#allocation8], 528  }
  0x16   :  { %529 = vsyncadd [#allocation8], 4294966768  ;;  %v99_v0 = vld [vmem:[#allocation4 + $0x30] sm:$0xff]  ;;  %v97_v1 = vld [vmem:[#allocation4 + $0x20] sm:$0xff]  ;;  %vm107_vm0 = vcmask 261120   ;;  %s539_s2 = smov 64  }
  0x17   :  { %v100_v2 = vld [vmem:[#allocation4 + $0x38] sm:$0xff]  ;;  %123 = vmatpush.msra.mxu0 %v99_v0  ;;  %v98_v3 = vld [vmem:[#allocation4 + $0x28] sm:$0xff]  ;;  %v95_v4 = vld [vmem:[#allocation4 + $0x10] sm:$0xff]  ;;  %s540_s4 = smov 96   ;;  %s541_s19 = smov 32   ;;  %vm361_vm1 = vcmask 1043456  }
  0x18   :  { %143 = vmatpush.msra.mxu1 %v100_v2  ;;  %v96_v5 = vld [vmem:[#allocation4 + $0x18] sm:$0xff]  ;;  %v93_v8 = vld [vmem:[#allocation4] sm:$0xff]  ;;  %v94_v9 = vld [vmem:[#allocation4 + $0x8] sm:$0xff] }
  0x19   :  { %124 = vmatpush.msra.mxu0 %v97_v1  ;;  %v154_v6 = vld [vmem:[#allocation7 + $0x18] sm:$0xff]  ;;  %v153_v7 = vld [vmem:[#allocation7 + $0x10] sm:$0xff]  ;;  %v152_v11 = vld [vmem:[#allocation7 + $0x8] sm:$0xff] }
  0x1a   :  { %144 = vmatpush.msra.mxu1 %v98_v3  ;;  %174 = vmatpush.msra.mxu2 %v154_v6  ;;  %v92_v10 = vld [vmem:[#allocation2] sm:$0xf]  ;;  %v151_v12 = vld [vmem:[#allocation7] sm:$0xff]  ;;  %v101_v13 = vld [vmem:[#allocation6] sm:$0x3] }
  0x1b   :  { %198 = vmatpush.msra.mxu3 %v154_v6  ;;  %125 = vmatpush.msra.mxu0 %v95_v4  ;;  %v103_v14 = vperm.slane %v101_v13, 0  ;;  %v104_v15 = vperm.slane %v101_v13, 1  ;;  %v403_v26 = vld [vmem:[#allocation9] ss:$0 sm:$0xff] }
  0x1c   :  { %145 = vmatpush.msra.mxu1 %v96_v5  ;;  %175 = vmatpush.msra.mxu2 %v153_v7 }
  0x1d   :  { %199 = vmatpush.msra.mxu3 %v153_v7  ;;  %126 = vmatpush.msra.mxu0 %v93_v8 }
  0x1e   :  { %146 = vmatpush.msra.mxu1 %v94_v9  ;;  %381 = vmatmul.msk.f32.vlgmr.msra.gmra.mxu0 %vm107_vm0, %v92_v10 }
  0x1f   :  { %382 = vmatmul.msk.f32.vlgmr.msra.gmra.mxu1 %vm107_vm0, %v92_v10  ;;  %222 = vmatpush.msrb.mxu0 %v154_v6 }
  0x20   :  { %246 = vmatpush.msrb.mxu1 %v154_v6  ;;  %176 = vmatpush.msra.mxu2 %v152_v11 }
  0x21   :  { %223 = vmatpush.msrb.mxu0 %v153_v7  ;;  %200 = vmatpush.msra.mxu3 %v152_v11 }
  0x22   :  { %247 = vmatpush.msrb.mxu1 %v153_v7  ;;  %177 = vmatpush.msra.mxu2 %v151_v12 }
  0x23   :  { %224 = vmatpush.msrb.mxu0 %v152_v11  ;;  %201 = vmatpush.msra.mxu3 %v151_v12 }
  0x24   :  { %248 = vmatpush.msrb.mxu1 %v152_v11  ;;  %269 = vmatpush.msrb.mxu2 %v154_v6 }
  0x25   :  { %225 = vmatpush.msrb.mxu0 %v151_v12  ;;  %293 = vmatpush.msrb.mxu3 %v154_v6 }
  0x26   :  { %270 = vmatpush.msrb.mxu2 %v153_v7  ;;  %249 = vmatpush.msrb.mxu1 %v151_v12 }
  0x27   :  { %317 = vmatpush.msra.mxu0 %v154_v6  ;;  %294 = vmatpush.msrb.mxu3 %v153_v7 }
  0x28   :  { %271 = vmatpush.msrb.mxu2 %v152_v11  ;;  %341 = vmatpush.msra.mxu1 %v154_v6 }
  0x29   :  { %318 = vmatpush.msra.mxu0 %v153_v7  ;;  %295 = vmatpush.msrb.mxu3 %v152_v11 }
  0x2a   :  { %272 = vmatpush.msrb.mxu2 %v151_v12  ;;  %342 = vmatpush.msra.mxu1 %v153_v7 }
  0x2b   :  { %319 = vmatpush.msra.mxu0 %v152_v11  ;;  %296 = vmatpush.msrb.mxu3 %v151_v12 }
  0x2c   :  { %343 = vmatpush.msra.mxu1 %v152_v11 }
  0x2d   :  { %320 = vmatpush.msra.mxu0 %v151_v12 }
  0x2e   :  { %344 = vmatpush.msra.mxu1 %v151_v12 }
  0x9b   :  { %v128_v16 = vpop.f32.mrf.mxu0 }
  0x9c   :  { %v148_v17 = vpop.f32.mrf.mxu1  ;;  %v129_v18 = vadd.f32 %v128_v16, %v103_v14 }
  0x9d   :  { %v149_v19 = vadd.f32 %v148_v17, %v104_v15 }
  0x9e   :  { %206 = vrot.lane.b32.xlu1 %v129_v18, %s539_s2  ;;  %182 = vrot.lane.b32.xlu0 %v129_v18, %s540_s4 }
  0x9f   :  { %383 = vmatmul.msk.f32.vlgmr.msra.gmra.mxu2 %vm107_vm0, %v129_v18  ;;  %325 = vrot.lane.b32.xlu2 %v149_v19, %s541_s19 }
  0xa6   :  { %277 = vrot.lane.b32.xlu1 %v149_v19, %s540_s4  ;;  %230 = vrot.lane.b32.xlu0 %v129_v18, %s541_s19 }
  0xa7   :  { %301 = vrot.lane.b32.xlu2 %v149_v19, %s539_s2  ;;  %387 = vmatmul.msk.f32.vlgmr.msrb.gmra.mxu2 %vm107_vm0, %v149_v19 }
  0xf9   :  { %v326_v20 = vpop.permute.xlu2 %325 }
 0x101   :  { %v302_v25 = vpop.permute.xlu2 %301 }
 0x110   :  { %v207_v21 = vpop.permute.xlu1 %206  ;;  %v183_v22 = vpop.permute.xlu0 %182 }
 0x111   :  { %384 = vmatmul.msk.f32.vlgmr.msra.gmra.mxu3 %vm107_vm0, %v183_v22  ;;  %385 = vmatmul.msk.f32.vlgmr.msrb.gmra.mxu0 %vm107_vm0, %v207_v21 }
 0x118   :  { %v278_v23 = vpop.permute.xlu1 %277  ;;  %v231_v24 = vpop.permute.xlu0 %230 }
 0x119   :  { %386 = vmatmul.msk.f32.vlgmr.msrb.gmra.mxu1 %vm107_vm0, %v231_v24  ;;  %388 = vmatmul.msk.f32.vlgmr.msrb.gmra.mxu3 %vm107_vm0, %v278_v23 }
 0x11a   :  { %389 = vmatmul.msk.f32.vlgmr.msra.gmra.mxu0 %vm107_vm0, %v302_v25 }
 0x121   :  { %390 = vmatmul.msk.f32.vlgmr.msra.gmra.mxu1 %vm107_vm0, %v326_v20 }
 0x122   :  { %v179_v27 = vpop.f32.mrf.mxu2 }
 0x123   :  { %v180_v32 = vadd.f32 %v403_v26, %v179_v27 }
 0x12a   :  { %v274_v39 = vpop.f32.mrf.mxu2 }
 0x12b   :  { %v275_v44 = vadd.f32 %v403_v26, %v274_v39 }
 0x18e   :  { %v227_v28 = vpop.f32.mrf.mxu0 }
 0x18f   :  { %v228_v35 = vadd.f32 %v403_v26, %v227_v28 }
 0x194   :  { %v203_v29 = vpop.f32.mrf.mxu3 }
 0x195   :  { %v204_v30 = vadd.f32 %v403_v26, %v203_v29 }
 0x196   :  { %v251_v31 = vpop.f32.mrf.mxu1 }
 0x197   :  { %v357_v33 = vrot.slane %v204_v30, 4  ;;  %v252_v34 = vadd.f32 %v403_v26, %v251_v31  ;;  %v322_v42 = vpop.f32.mrf.mxu0 }
 0x198   :  { %v323_v47 = vadd.f32 %v403_v26, %v322_v42 }
 0x199   :  { %v362_v36 = vsel %vm361_vm1, %v180_v32, %v357_v33  ;;  %v358_v37 = vrot.slane %v252_v34, 4 }
 0x19a   :  { %370 = vst [vmem:[%s618_s5] sm:$0xff] %v362_v36 }
 0x19b   :  { %v363_v38 = vsel %vm361_vm1, %v228_v35, %v358_v37 }
 0x19c   :  { %371 = vst [vmem:[%s618_s5 + $0x8] sm:$0xff] %v363_v38  ;;  %v298_v40 = vpop.f32.mrf.mxu3 }
 0x19d   :  { %v299_v41 = vadd.f32 %v403_v26, %v298_v40 }
 0x19e   :  { %v346_v43 = vpop.f32.mrf.mxu1 }
 0x19f   :  { %v359_v45 = vrot.slane %v299_v41, 4  ;;  %v347_v46 = vadd.f32 %v403_v26, %v346_v43 }
 0x1a1   :  { %v364_v48 = vsel %vm361_vm1, %v275_v44, %v359_v45  ;;  %v360_v49 = vrot.slane %v347_v46, 4 }
 0x1a2   :  { %372 = vst [vmem:[%s618_s5 + $0x10] sm:$0xff] %v364_v48 }
 0x1a3   :  { %v365_v50 = vsel %vm361_vm1, %v323_v47, %v360_v49 }
 0x1a4   :  { %373 = vst [vmem:[%s618_s5 + $0x18] sm:$0xff] %v365_v50 }
 0x1a5   :  { %378 = vsyncpa [#allocation3], 1 }
 0x1a6   :  { %379 = vsyncpa [#allocation5], 1 }
 0x1a7   :  { %380 = vsyncpa [#allocation8], 1 }

</bundles_post_ra>
